<compile_context>
chip_gen: v5e
topology: v5e:2x2
jax: 0.10.0
libtpu: 0.0.40
codegen_flags: <defaults>
</compile_context>

<pallas_src>
import functools

import jax
import jax.numpy as jnp
from jax.experimental import pallas as pl
from jax.experimental.pallas import tpu as pltpu


# ----------------------------------------------------------------------------
# Kernel
# ----------------------------------------------------------------------------
def make_critic_kernel(linear_output, act_size, hidden_size):
    S, A, H = linear_output, act_size, hidden_size
    H2 = 2 * H
    # static row offsets into the packed parameter slab
    r_w1s = 0            # (S,  2H)  layer-1 weights, state rows
    r_w1a = r_w1s + S    # (A,  2H)  layer-1 weights, action rows
    r_w2 = r_w1a + A     # (2H, 2H)  layer-2 block-diagonal
    r_w3 = r_w2 + H2     # (2H, 2H)  layer-3 block-diagonal
    r_w4 = r_w3 + H2     # (2H, 2H)  layer-4 packed (cols 0:2 used)
    r_b = r_w4 + H2      # 4 bias rows: b1, b2, b3, b4

    dot = functools.partial(
        jnp.dot,
        preferred_element_type=jnp.float32,
        precision=jax.lax.Precision.HIGHEST,
    )

    def kernel(state_ref, action_ref, slab_ref, out_ref):
        w1s = slab_ref[r_w1s:r_w1a, :]
        w1a = slab_ref[r_w1a:r_w2, :]
        w2 = slab_ref[r_w2:r_w3, :]
        w3 = slab_ref[r_w3:r_w4, :]
        w4 = slab_ref[r_w4:r_b, :]
        b1 = slab_ref[r_b + 0:r_b + 1, :]
        b2 = slab_ref[r_b + 1:r_b + 2, :]
        b3 = slab_ref[r_b + 2:r_b + 3, :]
        b4 = slab_ref[r_b + 3:r_b + 4, :]

        # layer 1: split matmul instead of concat([state, action]) @ W1
        h = dot(state_ref[...], w1s) + dot(action_ref[...], w1a) + b1
        h = jnp.maximum(h, 0.0)
        # layers 2-3 (block-diagonal fused twin nets)
        h = jnp.maximum(dot(h, w2) + b2, 0.0)
        h = jnp.maximum(dot(h, w3) + b3, 0.0)
        # layer 4: (B, 2H) lane-dense output; col0 = q1, col1 = q2, rest = 0
        out_ref[...] = (dot(h, w4) + b4).astype(out_ref.dtype)

    return kernel


# ----------------------------------------------------------------------------
# Parameter init (matches PyTorch MLP init) and one-time packing
# ----------------------------------------------------------------------------
def init_mlp_params(key, input_size, output_size, hidden_size, init_w=0.003):
    """Weights returned as (in, out); biases as (1, out)."""
    dims = [(input_size, hidden_size),
            (hidden_size, hidden_size),
            (hidden_size, hidden_size),
            (hidden_size, output_size)]
    params = []
    keys = jax.random.split(key, 2 * len(dims))
    for i, (fan_in, fan_out) in enumerate(dims):
        kw, kb = keys[2 * i], keys[2 * i + 1]
        bound = init_w if i == len(dims) - 1 else 1.0 / jnp.sqrt(jnp.float32(fan_in))
        w = jax.random.uniform(kw, (fan_in, fan_out), jnp.float32, -bound, bound)
        b = jax.random.uniform(kb, (1, fan_out), jnp.float32, -bound, bound)
        params.append((w, b))
    return params


def pack_critic_params(net1_params, net2_params, linear_output, act_size, hidden_size):
    """Pack both MLPs into one contiguous (rows, 2H) float32 slab.

    Layout (row offsets are multiples of 8 for the weight blocks):
      [0:S]        layer-1 weights, state rows      (S,  2H)
      [S:S+A]      layer-1 weights, action rows     (A,  2H)
      [..+2H]      layer-2 block-diagonal           (2H, 2H)
      [..+2H]      layer-3 block-diagonal           (2H, 2H)
      [..+2H]      layer-4 packed [q1 | q2 | 0...]  (2H, 2H)
      [..+4]       bias rows b1, b2, b3, b4         (4,  2H)
      padding to a multiple of 8 rows.
    """
    S, A, H = linear_output, act_size, hidden_size
    H2 = 2 * H
    (w11, b11), (w12, b12), (w13, b13), (w14, b14) = net1_params
    (w21, b21), (w22, b22), (w23, b23), (w24, b24) = net2_params

    w1 = jnp.concatenate([w11, w21], axis=1)          # (S+A, 2H)
    w1s, w1a = w1[:S], w1[S:]

    def block_diag(a, b):
        z = jnp.zeros((H, H), jnp.float32)
        top = jnp.concatenate([a, z], axis=1)
        bot = jnp.concatenate([z, b], axis=1)
        return jnp.concatenate([top, bot], axis=0)    # (2H, 2H)

    w2 = block_diag(w12, w22)
    w3 = block_diag(w13, w23)
    w4 = jnp.zeros((H2, H2), jnp.float32)
    w4 = w4.at[:H, 0:1].set(w14).at[H:, 1:2].set(w24)

    b1 = jnp.concatenate([b11, b21], axis=1)          # (1, 2H)
    b2 = jnp.concatenate([b12, b22], axis=1)
    b3 = jnp.concatenate([b13, b23], axis=1)
    b4 = jnp.zeros((1, H2), jnp.float32).at[:, 0:1].set(b14).at[:, 1:2].set(b24)

    slab = jnp.concatenate([w1s, w1a, w2, w3, w4, b1, b2, b3, b4], axis=0)
    pad = (-slab.shape[0]) % 8
    if pad:
        slab = jnp.concatenate([slab, jnp.zeros((pad, H2), jnp.float32)], axis=0)
    return slab


# ----------------------------------------------------------------------------
# Forward wrapper
# ----------------------------------------------------------------------------
@functools.partial(jax.jit, static_argnames=("linear_output", "act_size", "hidden_size"))
def critic_forward(state, action, param_slab, *, linear_output, act_size, hidden_size):
    B = state.shape[0]
    H2 = 2 * hidden_size
    kernel = make_critic_kernel(linear_output, act_size, hidden_size)
    vmem = pl.BlockSpec(memory_space=pltpu.MemorySpace.VMEM)

    out = pl.pallas_call(
        kernel,
        out_shape=jax.ShapeDtypeStruct((B, H2), jnp.float32),
        in_specs=[vmem, vmem, vmem],
        out_specs=vmem,
    )(state, action, param_slab)

    # split the fused lane-dense output into the two Q heads
    return out[:, 0:1], out[:, 1:2]


def critic_forward_ref(state, action, net1_params, net2_params):
    """Pure-JAX reference (same precision as the kernel for parity checks)."""
    sa = jnp.concatenate([state, action], axis=1)

    def mlp(x, params):
        h = x
        for i, (w, b) in enumerate(params):
            h = jnp.dot(h, w, precision=jax.lax.Precision.HIGHEST) + b
            if i < len(params) - 1:
                h = jnp.maximum(h, 0.0)
        return h

    return mlp(sa, net1_params), mlp(sa, net2_params)


# ----------------------------------------------------------------------------
if __name__ == "__main__":
    linear_output = 24
    act_size = 8
    hidden_size = 32
    batch = 8

    key = jax.random.PRNGKey(0)
    k_state, k_action, k_net1, k_net2 = jax.random.split(key, 4)

    state = jax.random.normal(k_state, (batch, linear_output), jnp.float32)
    action = jax.random.normal(k_action, (batch, act_size), jnp.float32)

    in_size = linear_output + act_size
    net1_params = init_mlp_params(k_net1, in_size, 1, hidden_size)
    net2_params = init_mlp_params(k_net2, in_size, 1, hidden_size)

    # Pack once, outside the hot path (single-slab operand for the kernel).
    param_slab = jax.block_until_ready(
        pack_critic_params(net1_params, net2_params,
                           linear_output, act_size, hidden_size))

    q1, q2 = critic_forward(state, action, param_slab,
                            linear_output=linear_output,
                            act_size=act_size,
                            hidden_size=hidden_size)
    jax.block_until_ready((q1, q2))

    # correctness check against pure-JAX reference
    r1, r2 = critic_forward_ref(state, action, net1_params, net2_params)
    assert q1.shape == (batch, 1) and q2.shape == (batch, 1)
    assert jnp.allclose(q1, r1, atol=1e-5, rtol=1e-5)
    assert jnp.allclose(q2, r2, atol=1e-5, rtol=1e-5)

    print("KERNEL_OK")
</pallas_src>

<mosaic_0001>
module attributes {stable_mosaic.version = 11 : i64} {
  func.func @kernel(%arg0: memref<8x24xf32, #tpu.memory_space<vmem>>, %arg1: memref<8x8xf32, #tpu.memory_space<vmem>>, %arg2: memref<232x64xf32, #tpu.memory_space<vmem>>, %arg3: memref<8x64xf32, #tpu.memory_space<vmem>>) attributes {dimension_semantics = [], scalar_prefetch = 0 : i64, scratch_operands = 0 : i64, tpu.core_type = #tpu.core_type<tc>} {
    %c0 = arith.constant 0 : index
    %c0_0 = arith.constant 0 : index
    %0 = vector.load %arg2[%c0, %c0_0] : memref<232x64xf32, #tpu.memory_space<vmem>>, vector<24x64xf32>
    %c24 = arith.constant 24 : index
    %c0_1 = arith.constant 0 : index
    %1 = vector.load %arg2[%c24, %c0_1] : memref<232x64xf32, #tpu.memory_space<vmem>>, vector<8x64xf32>
    %c32 = arith.constant 32 : index
    %c0_2 = arith.constant 0 : index
    %2 = vector.load %arg2[%c32, %c0_2] : memref<232x64xf32, #tpu.memory_space<vmem>>, vector<64x64xf32>
    %c96 = arith.constant 96 : index
    %c0_3 = arith.constant 0 : index
    %3 = vector.load %arg2[%c96, %c0_3] : memref<232x64xf32, #tpu.memory_space<vmem>>, vector<64x64xf32>
    %c160 = arith.constant 160 : index
    %c0_4 = arith.constant 0 : index
    %4 = vector.load %arg2[%c160, %c0_4] : memref<232x64xf32, #tpu.memory_space<vmem>>, vector<64x64xf32>
    %c224 = arith.constant 224 : index
    %c0_5 = arith.constant 0 : index
    %5 = vector.load %arg2[%c224, %c0_5] : memref<232x64xf32, #tpu.memory_space<vmem>>, vector<1x64xf32>
    %c225 = arith.constant 225 : index
    %c0_6 = arith.constant 0 : index
    %6 = vector.load %arg2[%c225, %c0_6] : memref<232x64xf32, #tpu.memory_space<vmem>>, vector<1x64xf32>
    %c226 = arith.constant 226 : index
    %c0_7 = arith.constant 0 : index
    %7 = vector.load %arg2[%c226, %c0_7] : memref<232x64xf32, #tpu.memory_space<vmem>>, vector<1x64xf32>
    %c227 = arith.constant 227 : index
    %c0_8 = arith.constant 0 : index
    %8 = vector.load %arg2[%c227, %c0_8] : memref<232x64xf32, #tpu.memory_space<vmem>>, vector<1x64xf32>
    %c0_9 = arith.constant 0 : index
    %c0_10 = arith.constant 0 : index
    %9 = vector.load %arg0[%c0_9, %c0_10] : memref<8x24xf32, #tpu.memory_space<vmem>>, vector<8x24xf32>
    %cst = arith.constant dense<0.000000e+00> : vector<8x64xf32>
    %10 = tpu.matmul %9, %0, %cst {dimension_numbers = #tpu.dot_dimension_numbers<[1], [0], [0], [1], [0, 0, 1, 1], [], []>, precision = #tpu.contract_precision<fp32>} : vector<8x24xf32>, vector<24x64xf32>, vector<8x64xf32> -> vector<8x64xf32>
    %c0_11 = arith.constant 0 : index
    %c0_12 = arith.constant 0 : index
    %11 = vector.load %arg1[%c0_11, %c0_12] : memref<8x8xf32, #tpu.memory_space<vmem>>, vector<8x8xf32>
    %cst_13 = arith.constant dense<0.000000e+00> : vector<8x64xf32>
    %12 = tpu.matmul %11, %1, %cst_13 {dimension_numbers = #tpu.dot_dimension_numbers<[1], [0], [0], [1], [0, 0, 1, 1], [], []>, precision = #tpu.contract_precision<fp32>} : vector<8x8xf32>, vector<8x64xf32>, vector<8x64xf32> -> vector<8x64xf32>
    %13 = arith.addf %10, %12 : vector<8x64xf32>
    %14 = vector.broadcast %5 : vector<1x64xf32> to vector<8x64xf32>
    %15 = arith.addf %13, %14 : vector<8x64xf32>
    %cst_14 = arith.constant 0.000000e+00 : f32
    %16 = vector.broadcast %cst_14 : f32 to vector<8x64xf32>
    %17 = arith.maximumf %15, %16 : vector<8x64xf32>
    %cst_15 = arith.constant dense<0.000000e+00> : vector<8x64xf32>
    %18 = tpu.matmul %17, %2, %cst_15 {dimension_numbers = #tpu.dot_dimension_numbers<[1], [0], [0], [1], [0, 0, 1, 1], [], []>, precision = #tpu.contract_precision<fp32>} : vector<8x64xf32>, vector<64x64xf32>, vector<8x64xf32> -> vector<8x64xf32>
    %19 = vector.broadcast %6 : vector<1x64xf32> to vector<8x64xf32>
    %20 = arith.addf %18, %19 : vector<8x64xf32>
    %cst_16 = arith.constant 0.000000e+00 : f32
    %21 = vector.broadcast %cst_16 : f32 to vector<8x64xf32>
    %22 = arith.maximumf %20, %21 : vector<8x64xf32>
    %cst_17 = arith.constant dense<0.000000e+00> : vector<8x64xf32>
    %23 = tpu.matmul %22, %3, %cst_17 {dimension_numbers = #tpu.dot_dimension_numbers<[1], [0], [0], [1], [0, 0, 1, 1], [], []>, precision = #tpu.contract_precision<fp32>} : vector<8x64xf32>, vector<64x64xf32>, vector<8x64xf32> -> vector<8x64xf32>
    %24 = vector.broadcast %7 : vector<1x64xf32> to vector<8x64xf32>
    %25 = arith.addf %23, %24 : vector<8x64xf32>
    %cst_18 = arith.constant 0.000000e+00 : f32
    %26 = vector.broadcast %cst_18 : f32 to vector<8x64xf32>
    %27 = arith.maximumf %25, %26 : vector<8x64xf32>
    %cst_19 = arith.constant dense<0.000000e+00> : vector<8x64xf32>
    %28 = tpu.matmul %27, %4, %cst_19 {dimension_numbers = #tpu.dot_dimension_numbers<[1], [0], [0], [1], [0, 0, 1, 1], [], []>, precision = #tpu.contract_precision<fp32>} : vector<8x64xf32>, vector<64x64xf32>, vector<8x64xf32> -> vector<8x64xf32>
    %29 = vector.broadcast %8 : vector<1x64xf32> to vector<8x64xf32>
    %30 = arith.addf %28, %29 : vector<8x64xf32>
    %c0_20 = arith.constant 0 : index
    %c0_21 = arith.constant 0 : index
    %31 = vector.load %arg3[%c0_20, %c0_21] : memref<8x64xf32, #tpu.memory_space<vmem>>, vector<8x64xf32>
    tpu.vector_store %arg3[%c0_20, %c0_21], %30 {strides = array<i32>} : memref<8x64xf32, #tpu.memory_space<vmem>>, vector<8x64xf32>,
    return
  }
}

</mosaic_0001>

<bundles_post_ra>
// kernel: critic_forward.1
= control target key start
LH: loop header
LB: loop body
LE: loop exit
PB: predicated region body
PF: predicated region fallthrough
CT: control target
= control target key end

     0   :  { %vm48_vm0 = vcmask 64512   ;;  %vm198_vm1 = vcmask 195584   ;;  %vm378_vm2 = vcmask 523264   ;;  %s1369_s2 = inlined_call_operand.vmem [shape: f32[232,64], index: 2, kind: input, shape index: {}]   ;;  %s1370_s1 = inlined_call_operand.vmem [shape: f32[8,8], index: 1, kind: input, shape index: {}]   ;;  %s1371_s0 = inlined_call_operand.vmem [shape: f32[8,24], index: 0, kind: input, shape index: {}]   ;;  %s1372_s3 = inlined_call_operand.vmem [shape: f32[8,64], index: 3, kind: output, shape index: {}]  }
   0x1   :  { %v17_v0 = vld [vmem:[%s1369_s2 + $0x18] sm:$0xff]  ;;  %v47_v1 = vld [vmem:[%s1370_s1] sm:$0xff]  ;;  %v16_v2 = vld [vmem:[%s1369_s2 + $0x10] sm:$0xff] }
   0x2   :  { %v67_v3 = vand.u32 4294901760, %v17_v0  ;;  %v50_v4 = vsel %vm48_vm0, %v47_v1, 0  ;;  %v215_v5 = vand.u32 4294901760, %v16_v2  ;;  %v15_v6 = vld [vmem:[%s1369_s2 + $0x8] sm:$0xff]  ;;  %v14_v7 = vld [vmem:[%s1369_s2] sm:$0xff]  ;;  %v25_v38 = vld [vmem:[%s1369_s2 + $0x58] sm:$0xff] }
   0x3   :  { %v46_v8 = vld [vmem:[%s1371_s0] sm:$0xff]  ;;  %v69_v9 = vand.u32 4294901760, %v50_v4  ;;  %v217_v10 = vand.u32 4294901760, %v15_v6  ;;  %v219_v11 = vand.u32 4294901760, %v14_v7  ;;  %v1153_v39 = vand.u32 4294901760, %v25_v38  ;;  %v24_v40 = vld [vmem:[%s1369_s2 + $0x50] sm:$0xff] }
   0x4   :  { %v200_v12 = vsel %vm198_vm1, %v46_v8, 0  ;;  %68 = vmatpush.msra.mxu2 %v67_v3  ;;  %v94_v13 = vsub.f32 %v17_v0, %v67_v3  ;;  %v244_v14 = vsub.f32 %v16_v2, %v215_v5  ;;  %192 = vmatpush.msra.mxu1 %v67_v3  ;;  %v1161_v42 = vand.u32 4294901760, %v24_v40  ;;  %v23_v43 = vld [vmem:[%s1369_s2 + $0x48] sm:$0xff]  ;;  %v22_v47 = vld [vmem:[%s1369_s2 + $0x40] sm:$0xff]  ;;  %v21_v52 = vld [vmem:[%s1369_s2 + $0x38] sm:$0xff] }
   0x5   :  { %v70_v15 = vsub.f32 %v50_v4, %v69_v9  ;;  %v250_v16 = vsub.f32 %v15_v6, %v217_v10  ;;  %v256_v17 = vsub.f32 %v14_v7, %v219_v11  ;;  %194 = vmatmul.f32.vlgmr.msra.gmra.mxu1 %v69_v9  ;;  %v221_v20 = vand.u32 4294901760, %v200_v12  ;;  %v20_v58 = vld [vmem:[%s1369_s2 + $0x30] sm:$0xff]  ;;  %v19_v0 = vld [vmem:[%s1369_s2 + $0x28] sm:$0xff]  ;;  %v18_v6 = vld [vmem:[%s1369_s2 + $0x20] sm:$0xff] }
   0x6   :  { %v95_v18 = vand.u32 4294901760, %v94_v13  ;;  %121 = vmatpush.msrb.mxu2 %v94_v13  ;;  %v245_v19 = vand.u32 4294901760, %v244_v14  ;;  %308 = vmatpush.msrb.mxu1 %v215_v5  ;;  %v1159_v41 = vsub.f32 %v25_v38, %v1153_v39  ;;  %v1170_v45 = vsub.f32 %v24_v40, %v1161_v42 }
   0x7   :  { %v71_v21 = vand.u32 4294901760, %v70_v15  ;;  %v251_v22 = vand.u32 4294901760, %v250_v16  ;;  %v257_v23 = vand.u32 4294901760, %v256_v17  ;;  %v222_v29 = vsub.f32 %v200_v12, %v221_v20 }
   0x8   :  { %v96_v24 = vsub.f32 %v94_v13, %v95_v18  ;;  %v246_v25 = vsub.f32 %v244_v14, %v245_v19  ;;  %170 = vmatpush.msra.mxu0 %v95_v18  ;;  %310 = vmatpush.msrb.mxu1 %v217_v10  ;;  %v425_v44 = vand.u32 4294901760, %v1159_v41  ;;  %v1172_v46 = vand.u32 4294901760, %v23_v43 }
   0x9   :  { %v72_v26 = vsub.f32 %v70_v15, %v71_v21  ;;  %v252_v27 = vsub.f32 %v250_v16, %v251_v22  ;;  %172 = vmatmul.f32.vlgmr.msra.gmra.mxu0 %v69_v9  ;;  %v258_v32 = vsub.f32 %v256_v17, %v257_v23  ;;  %v223_v34 = vand.u32 4294901760, %v222_v29 }
   0xa   :  { %v97_v28 = vand.u32 4294901760, %v96_v24  ;;  %281 = vmatpush.msrb.mxu0 %v244_v14  ;;  %312 = vmatpush.msrb.mxu1 %v219_v11  ;;  %v247_v31 = vand.u32 4294901760, %v246_v25  ;;  %v426_v48 = vsub.f32 %v1159_v41, %v425_v44  ;;  %v431_v49 = vand.u32 4294901760, %v1170_v45 }
   0xb   :  { %v73_v30 = vand.u32 4294901760, %v72_v26  ;;  %v253_v33 = vand.u32 4294901760, %v252_v27  ;;  %v259_v35 = vand.u32 4294901760, %v258_v32  ;;  %v224_v36 = vsub.f32 %v222_v29, %v223_v34 }
   0xc   :  { %98 = vmatpush.msra.mxu3 %v97_v28  ;;  %284 = vmatpush.msrb.mxu0 %v250_v16  ;;  %v1183_v50 = vsub.f32 %v23_v43, %v1172_v46  ;;  %v1185_v51 = vand.u32 4294901760, %v22_v47  ;;  %v427_v53 = vand.u32 4294901760, %v426_v48  ;;  %v432_v54 = vsub.f32 %v1170_v45, %v431_v49 }
   0xd   :  { %74 = vmatmul.f32.vlgmr.msra.gmra.mxu2 %v73_v30  ;;  %100 = vmatmul.f32.vlgmr.msra.gmra.mxu3 %v69_v9  ;;  %v225_v37 = vand.u32 4294901760, %v224_v36  ;;  %v1198_v57 = vand.u32 4294901760, %v21_v52  ;;  %v400_v62 = vand.u32 4294901760, %v20_v58  ;;  %v402_v4 = vand.u32 4294901760, %v19_v0 }
   0xe   :  { %144 = vmatpush.msrb.mxu3 %v67_v3  ;;  %216 = vmatpush.msra.mxu2 %v215_v5  ;;  %v437_v55 = vand.u32 4294901760, %v1183_v50  ;;  %v442_v56 = vsub.f32 %v22_v47, %v1185_v51  ;;  %v433_v59 = vand.u32 4294901760, %v432_v54  ;;  %v33_v54 = vld [vmem:[%s1369_s2 + $0x98] sm:$0xff] }
   0xf   :  { %287 = vmatpush.msrb.mxu0 %v256_v17  ;;  %316 = vmatmul.f32.vlgmr.msrb.gmra.mxu1 %v223_v34  ;;  %v448_v63 = vsub.f32 %v21_v52, %v1198_v57  ;;  %v454_v3 = vsub.f32 %v20_v58, %v400_v62  ;;  %v460_v9 = vsub.f32 %v19_v0, %v402_v4 }
  0x10   :  { %248 = vmatpush.msra.mxu3 %v247_v31  ;;  %218 = vmatpush.msra.mxu2 %v217_v10  ;;  %v438_v60 = vsub.f32 %v1183_v50, %v437_v55  ;;  %v443_v61 = vand.u32 4294901760, %v442_v56 }
  0x11   :  { %290 = vmatmul.f32.vlgmr.msrb.gmra.mxu0 %v222_v29  ;;  %428 = vmatpush.msra.mxu1 %v427_v53  ;;  %v455_v8 = vand.u32 4294901760, %v454_v3  ;;  %v461_v13 = vand.u32 4294901760, %v460_v9 }
  0x12   :  { %254 = vmatpush.msra.mxu3 %v253_v33  ;;  %220 = vmatpush.msra.mxu2 %v219_v11  ;;  %v439_v1 = vand.u32 4294901760, %v438_v60  ;;  %v444_v2 = vsub.f32 %v442_v56, %v443_v61 }
  0x13   :  { %391 = vmatpush.msra.mxu0 %v1153_v39  ;;  %434 = vmatpush.msra.mxu1 %v433_v59  ;;  %v456_v12 = vsub.f32 %v454_v3, %v455_v8  ;;  %v462_v17 = vsub.f32 %v460_v9, %v461_v13 }
  0x14   :  { %260 = vmatpush.msra.mxu3 %v259_v35  ;;  %v445_v7 = vand.u32 4294901760, %v444_v2 }
  0x15   :  { %124 = vmatmul.f32.vlgmr.msrb.gmra.mxu2 %v70_v15  ;;  %148 = vmatmul.f32.vlgmr.msrb.gmra.mxu3 %v71_v21  ;;  %v457_v16 = vand.u32 4294901760, %v456_v12 }
  0x16   :  { %336 = vmatpush.msrb.mxu2 %v245_v19  ;;  %364 = vmatpush.msrb.mxu3 %v215_v5  ;;  %v449_v5 = vand.u32 4294901760, %v448_v63  ;;  %v463_v19 = vand.u32 4294901760, %v462_v17 }
  0x17   :  { %393 = vmatpush.msra.mxu0 %v1161_v42  ;;  %440 = vmatpush.msra.mxu1 %v439_v1  ;;  %v30_v1 = vld [vmem:[%s1369_s2 + $0x80] sm:$0xff] }
  0x18   :  { %340 = vmatpush.msrb.mxu2 %v251_v22  ;;  %366 = vmatpush.msrb.mxu3 %v217_v10  ;;  %v404_v10 = vand.u32 4294901760, %v18_v6 }
  0x19   :  { %395 = vmatpush.msra.mxu0 %v1172_v46  ;;  %446 = vmatpush.msra.mxu1 %v445_v7 }
  0x1a   :  { %344 = vmatpush.msrb.mxu2 %v257_v23  ;;  %368 = vmatpush.msrb.mxu3 %v219_v11  ;;  %v450_v11 = vsub.f32 %v448_v63, %v449_v5  ;;  %v466_v14 = vsub.f32 %v18_v6, %v404_v10  ;;  %v29_v6 = vld [vmem:[%s1369_s2 + $0x78] sm:$0xff] }
  0x1b   :  { %397 = vmatpush.msra.mxu0 %v1185_v51 }
  0x1c   :  { %v451_v15 = vand.u32 4294901760, %v450_v11  ;;  %v467_v18 = vand.u32 4294901760, %v466_v14  ;;  %v28_v11 = vld [vmem:[%s1369_s2 + $0x70] sm:$0xff] }
  0x1d   :  { %226 = vmatmul.f32.vlgmr.msra.gmra.mxu2 %v225_v37  ;;  %262 = vmatmul.f32.vlgmr.msra.gmra.mxu3 %v221_v20 }
  0x1e   :  { %523 = vmatpush.msra.mxu3 %v1153_v39  ;;  %486 = vmatpush.msra.mxu2 %v1159_v41 }
  0x1f   :  { %399 = vmatpush.msra.mxu0 %v1198_v57  ;;  %452 = vmatpush.msra.mxu1 %v451_v15  ;;  %v642_v15 = vand.u32 4294901760, %v28_v11 }
  0x20   :  { %525 = vmatpush.msra.mxu3 %v1161_v42  ;;  %489 = vmatpush.msra.mxu2 %v1170_v45 }
  0x21   :  { %401 = vmatpush.msra.mxu0 %v400_v62  ;;  %458 = vmatpush.msra.mxu1 %v457_v16  ;;  %v27_v16 = vld [vmem:[%s1369_s2 + $0x68] sm:$0xff] }
  0x22   :  { %527 = vmatpush.msra.mxu3 %v1172_v46  ;;  %492 = vmatpush.msra.mxu2 %v1183_v50 }
  0x23   :  { %403 = vmatpush.msra.mxu0 %v402_v4  ;;  %464 = vmatpush.msra.mxu1 %v463_v19 }
  0x24   :  { %529 = vmatpush.msra.mxu3 %v1185_v51  ;;  %495 = vmatpush.msra.mxu2 %v442_v56  ;;  %v32_v56 = vld [vmem:[%s1369_s2 + $0x90] sm:$0xff] }
  0x25   :  { %346 = vmatmul.f32.vlgmr.msrb.gmra.mxu2 %v221_v20  ;;  %370 = vmatmul.f32.vlgmr.msrb.gmra.mxu3 %v221_v20  ;;  %v468_v20 = vsub.f32 %v466_v14, %v467_v18  ;;  %v1234_v58 = vand.u32 4294901760, %v32_v56 }
  0x26   :  { %531 = vmatpush.msra.mxu3 %v1198_v57  ;;  %498 = vmatpush.msra.mxu2 %v448_v63 }
  0x27   :  { %405 = vmatpush.msra.mxu0 %v404_v10  ;;  %v469_v21 = vand.u32 4294901760, %v468_v20  ;;  %v1240_v60 = vsub.f32 %v32_v56, %v1234_v58  ;;  %v696_v20 = vsub.f32 %v28_v11, %v642_v15 }
  0x28   :  { %533 = vmatpush.msra.mxu3 %v400_v62  ;;  %501 = vmatpush.msra.mxu2 %v454_v3  ;;  %v1259_v3 = vand.u32 4294901760, %v30_v1 }
  0x29   :  { %556 = vmatpush.msrb.mxu0 %v425_v44  ;;  %470 = vmatpush.msra.mxu1 %v469_v21  ;;  %v1108_v44 = vld [vmem:[%s1369_s2 + $0xe0] ss:$0 sm:$0xff]  ;;  %v673_v0 = vand.u32 4294901760, %v1240_v60  ;;  %v644_v21 = vand.u32 4294901760, %v27_v16 }
  0x2a   :  { %535 = vmatpush.msra.mxu3 %v402_v4  ;;  %504 = vmatpush.msra.mxu2 %v460_v9  ;;  %v1268_v9 = vand.u32 4294901760, %v29_v6 }
  0x2b   :  { %560 = vmatpush.msrb.mxu0 %v431_v49  ;;  %599 = vmatpush.msrb.mxu1 %v1153_v39 }
  0x2c   :  { %537 = vmatpush.msra.mxu3 %v404_v10  ;;  %507 = vmatpush.msra.mxu2 %v466_v14  ;;  %v690_v14 = vsub.f32 %v29_v6, %v1268_v9 }
  0x2d   :  { %564 = vmatpush.msrb.mxu0 %v437_v55  ;;  %601 = vmatpush.msrb.mxu1 %v1161_v42  ;;  %v1226_v55 = vand.u32 4294901760, %v33_v54 }
  0x2e   :  { %v691_v19 = vand.u32 4294901760, %v690_v14 }
  0x2f   :  { %568 = vmatpush.msrb.mxu0 %v443_v61  ;;  %603 = vmatpush.msrb.mxu1 %v1172_v46  ;;  %v31_v61 = vld [vmem:[%s1369_s2 + $0x88] sm:$0xff] }
  0x30   :  { %633 = vmatpush.msrb.mxu2 %v1226_v55 }
  0x31   :  { %572 = vmatpush.msrb.mxu0 %v449_v5  ;;  %605 = vmatpush.msrb.mxu1 %v1185_v51  ;;  %v674_v5 = vsub.f32 %v1240_v60, %v673_v0 }
  0x32   :  { %635 = vmatpush.msrb.mxu2 %v1234_v58 }
  0x33   :  { %576 = vmatpush.msrb.mxu0 %v455_v8  ;;  %607 = vmatpush.msrb.mxu1 %v1198_v57  ;;  %v1232_v57 = vsub.f32 %v33_v54, %v1226_v55  ;;  %v684_v8 = vsub.f32 %v30_v1, %v1259_v3 }
  0x35   :  { %580 = vmatpush.msrb.mxu0 %v461_v13  ;;  %609 = vmatpush.msrb.mxu1 %v400_v62  ;;  %v667_v59 = vand.u32 4294901760, %v1232_v57  ;;  %v1247_v62 = vand.u32 4294901760, %v31_v61  ;;  %v685_v13 = vand.u32 4294901760, %v684_v8 }
  0x37   :  { %584 = vmatpush.msrb.mxu0 %v467_v18  ;;  %611 = vmatpush.msrb.mxu1 %v402_v4  ;;  %v668_v63 = vsub.f32 %v1232_v57, %v667_v59  ;;  %v678_v2 = vsub.f32 %v31_v61, %v1247_v62  ;;  %v686_v18 = vsub.f32 %v684_v8, %v685_v13 }
  0x38   :  { %637 = vmatpush.msrb.mxu2 %v1247_v62 }
  0x39   :  { %613 = vmatpush.msrb.mxu1 %v404_v10  ;;  %v669_v4 = vand.u32 4294901760, %v668_v63  ;;  %v679_v7 = vand.u32 4294901760, %v678_v2  ;;  %v675_v10 = vand.u32 4294901760, %v674_v5  ;;  %v39_v63 = vld [vmem:[%s1369_s2 + $0xc8] sm:$0xff] }
  0x3a   :  { %639 = vmatpush.msrb.mxu2 %v1259_v3 }
  0x3b   :  { %670 = vmatpush.msrb.mxu3 %v669_v4  ;;  %v680_v12 = vsub.f32 %v678_v2, %v679_v7 }
  0x3c   :  { %641 = vmatpush.msrb.mxu2 %v1268_v9 }
  0x3d   :  { %676 = vmatpush.msrb.mxu3 %v675_v10  ;;  %v681_v17 = vand.u32 4294901760, %v680_v12 }
  0x3e   :  { %643 = vmatpush.msrb.mxu2 %v642_v15 }
  0x3f   :  { %682 = vmatpush.msrb.mxu3 %v681_v17 }
  0x40   :  { %645 = vmatpush.msrb.mxu2 %v644_v21 }
  0x82   :  { %v195_v29 = vpop.f32.mrf.mxu1 }
  0x86   :  { %v173_v25 = vpop.f32.mrf.mxu0 }
  0x8c   :  { %v317_v38 = vpop.f32.mrf.mxu1 }
  0x8e   :  { %v291_v36 = vpop.f32.mrf.mxu0 }
  0x90   :  { %v75_v22 = vpop.f32.mrf.mxu2  ;;  %v101_v23 = vpop.f32.mrf.mxu3 }
  0x91   :  { %v102_v24 = vadd.f32 %v101_v23, %v75_v22  ;;  %v26_v22 = vld [vmem:[%s1369_s2 + $0x60] sm:$0xff]  ;;  %v687_v23 = vand.u32 4294901760, %v686_v18 }
  0x93   :  { %688 = vmatpush.msrb.mxu3 %v687_v23 }
  0x98   :  { %v125_v26 = vpop.f32.mrf.mxu2  ;;  %v149_v27 = vpop.f32.mrf.mxu3 }
  0x99   :  { %v126_v28 = vadd.f32 %v125_v26, %v102_v24  ;;  %v692_v24 = vsub.f32 %v690_v14, %v691_v19  ;;  %v646_v26 = vand.u32 4294901760, %v26_v22 }
  0x9b   :  { %v150_v30 = vadd.f32 %v149_v27, %v126_v28  ;;  %v702_v27 = vsub.f32 %v27_v16, %v644_v21  ;;  %v693_v28 = vand.u32 4294901760, %v692_v24  ;;  %647 = vmatpush.msrb.mxu2 %v646_v26 }
  0x9d   :  { %v174_v31 = vadd.f32 %v173_v25, %v150_v30  ;;  %v697_v25 = vand.u32 4294901760, %v696_v20  ;;  %v708_v30 = vsub.f32 %v26_v22, %v646_v26  ;;  %694 = vmatpush.msrb.mxu3 %v693_v28 }
  0x9f   :  { %v196_v32 = vadd.f32 %v195_v29, %v174_v31  ;;  %v698_v29 = vsub.f32 %v696_v20, %v697_v25  ;;  %v703_v31 = vand.u32 4294901760, %v702_v27 }
  0xa0   :  { %v227_v33 = vpop.f32.mrf.mxu2  ;;  %v263_v34 = vpop.f32.mrf.mxu3 }
  0xa1   :  { %v228_v35 = vadd.f32 %v227_v33, %v196_v32  ;;  %v699_v32 = vand.u32 4294901760, %v698_v29  ;;  %v709_v33 = vand.u32 4294901760, %v708_v30 }
  0xa3   :  { %v264_v37 = vadd.f32 %v263_v34, %v228_v35  ;;  %v704_v34 = vsub.f32 %v702_v27, %v703_v31  ;;  %700 = vmatpush.msrb.mxu3 %v699_v32  ;;  %v710_v35 = vsub.f32 %v708_v30, %v709_v33 }
  0xa5   :  { %v292_v39 = vadd.f32 %v291_v36, %v264_v37  ;;  %v705_v36 = vand.u32 4294901760, %v704_v34  ;;  %v711_v37 = vand.u32 4294901760, %v710_v35 }
  0xa7   :  { %v318_v40 = vadd.f32 %v317_v38, %v292_v39  ;;  %706 = vmatpush.msrb.mxu3 %v705_v36  ;;  %v1109_v38 = vld [vmem:[%s1369_s2 + $0xe1] ss:$0 sm:$0xff] }
  0xa8   :  { %v347_v41 = vpop.f32.mrf.mxu2  ;;  %v371_v42 = vpop.f32.mrf.mxu3 }
  0xa9   :  { %v348_v43 = vadd.f32 %v347_v41, %v318_v40  ;;  %712 = vmatpush.msrb.mxu3 %v711_v37 }
  0xab   :  { %v372_v45 = vadd.f32 %v371_v42, %v348_v43 }
  0xad   :  { %v375_v46 = vadd.f32 %v1108_v44, %v372_v45 }
  0xaf   :  { %v376_v47 = vmax.f32 %v375_v46, 0.0 }
  0xb1   :  { %v380_v48 = vsel %vm378_vm2, %v376_v47, 0 }
  0xb2   :  { %v406_v49 = vand.u32 4294901760, %v380_v48 }
  0xb4   :  { %v407_v50 = vsub.f32 %v380_v48, %v406_v49  ;;  %472 = vmatmul.f32.vlgmr.msra.gmra.mxu1 %v406_v49 }
  0xb5   :  { %765 = vmatpush.msra.mxu1 %v1226_v55 }
  0xb6   :  { %510 = vmatmul.f32.vlgmr.msra.gmra.mxu2 %v407_v50  ;;  %v408_v51 = vand.u32 4294901760, %v407_v50 }
  0xb7   :  { %767 = vmatpush.msra.mxu1 %v1234_v58  ;;  %798 = vmatpush.msra.mxu2 %v667_v59 }
  0xb8   :  { %541 = vmatmul.f32.vlgmr.msra.gmra.mxu3 %v408_v51  ;;  %v409_v52 = vsub.f32 %v407_v50, %v408_v51 }
  0xb9   :  { %769 = vmatpush.msra.mxu1 %v1247_v62  ;;  %802 = vmatpush.msra.mxu2 %v673_v0 }
  0xba   :  { %v410_v53 = vand.u32 4294901760, %v409_v52  ;;  %841 = vmatpush.msra.mxu3 %v1226_v55 }
  0xbb   :  { %771 = vmatpush.msra.mxu1 %v1259_v3  ;;  %806 = vmatpush.msra.mxu2 %v679_v7 }
  0xbc   :  { %411 = vmatmul.f32.vlgmr.msra.gmra.mxu0 %v410_v53  ;;  %615 = vmatmul.f32.vlgmr.msrb.gmra.mxu1 %v406_v49 }
  0xbd   :  { %728 = vmatpush.msra.mxu0 %v1232_v57  ;;  %773 = vmatpush.msra.mxu1 %v1268_v9 }
  0xbe   :  { %810 = vmatpush.msra.mxu2 %v685_v13  ;;  %843 = vmatpush.msra.mxu3 %v1234_v58  ;;  %v41_v58 = vld [vmem:[%s1369_s2 + $0xd8] sm:$0xff] }
  0xbf   :  { %731 = vmatpush.msra.mxu0 %v1240_v60  ;;  %775 = vmatpush.msra.mxu1 %v642_v15  ;;  %v1298_v59 = vand.u32 4294901760, %v41_v58  ;;  %v40_v60 = vld [vmem:[%s1369_s2 + $0xd0] sm:$0xff] }
  0xc0   :  { %814 = vmatpush.msra.mxu2 %v691_v19  ;;  %845 = vmatpush.msra.mxu3 %v1247_v62  ;;  %v1306_v62 = vand.u32 4294901760, %v40_v60 }
  0xc1   :  { %734 = vmatpush.msra.mxu0 %v678_v2  ;;  %777 = vmatpush.msra.mxu1 %v644_v21  ;;  %v1304_v61 = vsub.f32 %v41_v58, %v1298_v59  ;;  %v1317_v2 = vand.u32 4294901760, %v39_v63 }
  0xc2   :  { %818 = vmatpush.msra.mxu2 %v697_v25  ;;  %847 = vmatpush.msra.mxu3 %v1259_v3  ;;  %v1315_v1 = vsub.f32 %v40_v60, %v1306_v62  ;;  %v38_v3 = vld [vmem:[%s1369_s2 + $0xc0] sm:$0xff] }
  0xc3   :  { %737 = vmatpush.msra.mxu0 %v684_v8  ;;  %779 = vmatpush.msra.mxu1 %v646_v26  ;;  %v909_v0 = vand.u32 4294901760, %v1304_v61  ;;  %v1328_v6 = vsub.f32 %v39_v63, %v1317_v2  ;;  %v1330_v7 = vand.u32 4294901760, %v38_v3  ;;  %v37_v8 = vld [vmem:[%s1369_s2 + $0xb8] sm:$0xff] }
  0xc4   :  { %586 = vmatmul.f32.vlgmr.msrb.gmra.mxu0 %v406_v49  ;;  %822 = vmatpush.msra.mxu2 %v703_v31  ;;  %v915_v5 = vand.u32 4294901760, %v1315_v1  ;;  %v882_v13 = vand.u32 4294901760, %v37_v8 }
  0xc5   :  { %740 = vmatpush.msra.mxu0 %v690_v14  ;;  %849 = vmatpush.msra.mxu3 %v1268_v9  ;;  %v910_v4 = vsub.f32 %v1304_v61, %v909_v0  ;;  %v921_v11 = vand.u32 4294901760, %v1328_v6  ;;  %v926_v12 = vsub.f32 %v38_v3, %v1330_v7  ;;  %v36_v14 = vld [vmem:[%s1369_s2 + $0xb0] sm:$0xff] }
  0xc6   :  { %826 = vmatpush.msra.mxu2 %v709_v33  ;;  %v916_v10 = vsub.f32 %v1315_v1, %v915_v5  ;;  %v884_v18 = vand.u32 4294901760, %v36_v14  ;;  %v932_v19 = vsub.f32 %v37_v8, %v882_v13 }
  0xc7   :  { %743 = vmatpush.msra.mxu0 %v696_v20  ;;  %851 = vmatpush.msra.mxu3 %v642_v15  ;;  %v911_v9 = vand.u32 4294901760, %v910_v4  ;;  %v922_v16 = vsub.f32 %v1328_v6, %v921_v11  ;;  %v927_v17 = vand.u32 4294901760, %v926_v12  ;;  %v35_v20 = vld [vmem:[%s1369_s2 + $0xa8] sm:$0xff] }
  0xc8   :  { %v917_v15 = vand.u32 4294901760, %v916_v10  ;;  %v938_v23 = vsub.f32 %v36_v14, %v884_v18  ;;  %v886_v24 = vand.u32 4294901760, %v35_v20  ;;  %v933_v25 = vand.u32 4294901760, %v932_v19 }
  0xc9   :  { %746 = vmatpush.msra.mxu0 %v702_v27  ;;  %853 = vmatpush.msra.mxu3 %v644_v21  ;;  %v923_v21 = vand.u32 4294901760, %v922_v16  ;;  %v928_v22 = vsub.f32 %v926_v12, %v927_v17 }
  0xca   :  { %912 = vmatpush.msrb.mxu1 %v911_v9  ;;  %v939_v28 = vand.u32 4294901760, %v938_v23  ;;  %v944_v29 = vsub.f32 %v35_v20, %v886_v24  ;;  %v934_v31 = vsub.f32 %v932_v19, %v933_v25 }
  0xcb   :  { %749 = vmatpush.msra.mxu0 %v708_v30  ;;  %855 = vmatpush.msra.mxu3 %v646_v26  ;;  %v34_v26 = vld [vmem:[%s1369_s2 + $0xa0] sm:$0xff]  ;;  %v929_v27 = vand.u32 4294901760, %v928_v22 }
  0xcc   :  { %918 = vmatpush.msrb.mxu1 %v917_v15  ;;  %v888_v30 = vand.u32 4294901760, %v34_v26  ;;  %v940_v32 = vsub.f32 %v938_v23, %v939_v28  ;;  %v945_v33 = vand.u32 4294901760, %v944_v29  ;;  %v935_v35 = vand.u32 4294901760, %v934_v31 }
  0xcd   :  { %875 = vmatpush.msrb.mxu0 %v1298_v59 }
  0xce   :  { %924 = vmatpush.msrb.mxu1 %v923_v21  ;;  %v950_v34 = vsub.f32 %v34_v26, %v888_v30  ;;  %v941_v36 = vand.u32 4294901760, %v940_v32  ;;  %v946_v37 = vsub.f32 %v944_v29, %v945_v33 }
  0xcf   :  { %877 = vmatpush.msrb.mxu0 %v1306_v62 }
  0xd0   :  { %930 = vmatpush.msrb.mxu1 %v929_v27 }
  0xd1   :  { %879 = vmatpush.msrb.mxu0 %v1317_v2 }
  0xd2   :  { %936 = vmatpush.msrb.mxu1 %v935_v35 }
  0xd3   :  { %881 = vmatpush.msrb.mxu0 %v1330_v7 }
  0xd4   :  { %942 = vmatpush.msrb.mxu1 %v941_v36 }
  0xd5   :  { %883 = vmatpush.msrb.mxu0 %v882_v13 }
  0xd7   :  { %885 = vmatpush.msrb.mxu0 %v884_v18 }
  0xd9   :  { %887 = vmatpush.msrb.mxu0 %v886_v24 }
  0xdb   :  { %889 = vmatpush.msrb.mxu0 %v888_v30 }
 0x131   :  { %v473_v39 = vpop.f32.mrf.mxu1 }
 0x139   :  { %v412_v40 = vpop.f32.mrf.mxu0  ;;  %v511_v43 = vpop.f32.mrf.mxu2 }
 0x13a   :  { %v413_v41 = vadd.f32 %v1109_v38, %v412_v40  ;;  %v616_v49 = vpop.f32.mrf.mxu1  ;;  %v951_v38 = vand.u32 4294901760, %v950_v34 }
 0x13b   :  { %v542_v45 = vpop.f32.mrf.mxu3 }
 0x13c   :  { %v474_v42 = vadd.f32 %v473_v39, %v413_v41  ;;  %v947_v39 = vand.u32 4294901760, %v946_v37  ;;  %v952_v40 = vsub.f32 %v950_v34, %v951_v38 }
 0x13e   :  { %v512_v44 = vadd.f32 %v511_v43, %v474_v42  ;;  %v953_v41 = vand.u32 4294901760, %v952_v40  ;;  %948 = vmatpush.msrb.mxu1 %v947_v39  ;;  %v1110_v42 = vld [vmem:[%s1369_s2 + $0xe2] ss:$0 sm:$0xff] }
 0x140   :  { %v543_v46 = vadd.f32 %v542_v45, %v512_v44  ;;  %954 = vmatpush.msrb.mxu1 %v953_v41 }
 0x141   :  { %v587_v47 = vpop.f32.mrf.mxu0 }
 0x142   :  { %v588_v48 = vadd.f32 %v587_v47, %v543_v46 }
 0x144   :  { %v617_v50 = vadd.f32 %v616_v49, %v588_v48 }
 0x146   :  { %v619_v51 = vmax.f32 %v617_v50, 0.0 }
 0x148   :  { %v622_v52 = vsel %vm378_vm2, %v619_v51, 0 }
 0x149   :  { %v648_v53 = vand.u32 4294901760, %v622_v52 }
 0x14b   :  { %v649_v54 = vsub.f32 %v622_v52, %v648_v53  ;;  %714 = vmatmul.f32.vlgmr.msrb.gmra.mxu3 %v648_v53 }
 0x14c   :  { %1007 = vmatpush.msrb.mxu3 %v1298_v59 }
 0x14d   :  { %752 = vmatmul.f32.vlgmr.msra.gmra.mxu0 %v649_v54  ;;  %v650_v55 = vand.u32 4294901760, %v649_v54 }
 0x14e   :  { %1009 = vmatpush.msrb.mxu3 %v1306_v62  ;;  %1040 = vmatpush.msra.mxu0 %v909_v0 }
 0x14f   :  { %783 = vmatmul.f32.vlgmr.msra.gmra.mxu1 %v650_v55  ;;  %v651_v56 = vsub.f32 %v649_v54, %v650_v55 }
 0x150   :  { %1011 = vmatpush.msrb.mxu3 %v1317_v2  ;;  %1044 = vmatpush.msra.mxu0 %v915_v5 }
 0x151   :  { %v652_v57 = vand.u32 4294901760, %v651_v56  ;;  %1083 = vmatpush.msra.mxu1 %v1298_v59 }
 0x152   :  { %1013 = vmatpush.msrb.mxu3 %v1330_v7  ;;  %1048 = vmatpush.msra.mxu0 %v921_v11 }
 0x153   :  { %653 = vmatmul.f32.vlgmr.msrb.gmra.mxu2 %v652_v57  ;;  %857 = vmatmul.f32.vlgmr.msra.gmra.mxu3 %v648_v53 }
 0x154   :  { %970 = vmatpush.msrb.mxu2 %v1304_v61  ;;  %1015 = vmatpush.msrb.mxu3 %v882_v13 }
 0x155   :  { %1052 = vmatpush.msra.mxu0 %v927_v17  ;;  %1085 = vmatpush.msra.mxu1 %v1306_v62  ;;  %v1111_v62 = vld [vmem:[%s1369_s2 + $0xe3] ss:$0 sm:$0xff] }
 0x156   :  { %973 = vmatpush.msrb.mxu2 %v1315_v1  ;;  %1017 = vmatpush.msrb.mxu3 %v884_v18 }
 0x157   :  { %1056 = vmatpush.msra.mxu0 %v933_v25  ;;  %1087 = vmatpush.msra.mxu1 %v1317_v2 }
 0x158   :  { %976 = vmatpush.msrb.mxu2 %v1328_v6  ;;  %1019 = vmatpush.msrb.mxu3 %v886_v24 }
 0x159   :  { %1060 = vmatpush.msra.mxu0 %v939_v28  ;;  %1089 = vmatpush.msra.mxu1 %v1330_v7 }
 0x15a   :  { %979 = vmatpush.msrb.mxu2 %v926_v12  ;;  %1021 = vmatpush.msrb.mxu3 %v888_v30 }
 0x15b   :  { %828 = vmatmul.f32.vlgmr.msra.gmra.mxu2 %v648_v53  ;;  %1064 = vmatpush.msra.mxu0 %v945_v33 }
 0x15c   :  { %982 = vmatpush.msrb.mxu2 %v932_v19  ;;  %1091 = vmatpush.msra.mxu1 %v882_v13 }
 0x15d   :  { %1068 = vmatpush.msra.mxu0 %v951_v38 }
 0x15e   :  { %985 = vmatpush.msrb.mxu2 %v938_v23  ;;  %1093 = vmatpush.msra.mxu1 %v884_v18 }
 0x160   :  { %988 = vmatpush.msrb.mxu2 %v944_v29  ;;  %1095 = vmatpush.msra.mxu1 %v886_v24 }
 0x162   :  { %991 = vmatpush.msrb.mxu2 %v950_v34  ;;  %1097 = vmatpush.msra.mxu1 %v888_v30 }
 0x1ca   :  { %v753_v47 = vpop.f32.mrf.mxu0 }
 0x1cc   :  { %v784_v49 = vpop.f32.mrf.mxu1 }
 0x1ce   :  { %v715_v43 = vpop.f32.mrf.mxu3 }
 0x1d6   :  { %v654_v44 = vpop.f32.mrf.mxu2  ;;  %v858_v53 = vpop.f32.mrf.mxu3 }
 0x1d7   :  { %v655_v45 = vadd.f32 %v1110_v42, %v654_v44 }
 0x1d9   :  { %v716_v46 = vadd.f32 %v715_v43, %v655_v45 }
 0x1db   :  { %v754_v48 = vadd.f32 %v753_v47, %v716_v46 }
 0x1dd   :  { %v785_v50 = vadd.f32 %v784_v49, %v754_v48 }
 0x1de   :  { %v829_v51 = vpop.f32.mrf.mxu2 }
 0x1df   :  { %v830_v52 = vadd.f32 %v829_v51, %v785_v50 }
 0x1e1   :  { %v859_v54 = vadd.f32 %v858_v53, %v830_v52 }
 0x1e3   :  { %v861_v55 = vmax.f32 %v859_v54, 0.0 }
 0x1e5   :  { %v864_v56 = vsel %vm378_vm2, %v861_v55, 0 }
 0x1e6   :  { %v890_v57 = vand.u32 4294901760, %v864_v56 }
 0x1e8   :  { %v891_v58 = vsub.f32 %v864_v56, %v890_v57  ;;  %956 = vmatmul.f32.vlgmr.msrb.gmra.mxu1 %v890_v57 }
 0x1ea   :  { %994 = vmatmul.f32.vlgmr.msrb.gmra.mxu2 %v891_v58  ;;  %v892_v59 = vand.u32 4294901760, %v891_v58 }
 0x1ec   :  { %1025 = vmatmul.f32.vlgmr.msrb.gmra.mxu3 %v892_v59  ;;  %v893_v60 = vsub.f32 %v891_v58, %v892_v59 }
 0x1ee   :  { %v894_v61 = vand.u32 4294901760, %v893_v60 }
 0x1f0   :  { %895 = vmatmul.f32.vlgmr.msrb.gmra.mxu0 %v894_v61  ;;  %1099 = vmatmul.f32.vlgmr.msra.gmra.mxu1 %v890_v57 }
 0x1f8   :  { %1070 = vmatmul.f32.vlgmr.msra.gmra.mxu0 %v890_v57 }
 0x265   :  { %v957_v63 = vpop.f32.mrf.mxu1 }
 0x26d   :  { %v896_v0 = vpop.f32.mrf.mxu0  ;;  %v995_v3 = vpop.f32.mrf.mxu2 }
 0x26e   :  { %v897_v1 = vadd.f32 %v1111_v62, %v896_v0  ;;  %v1100_v9 = vpop.f32.mrf.mxu1 }
 0x26f   :  { %v1026_v5 = vpop.f32.mrf.mxu3 }
 0x270   :  { %v958_v2 = vadd.f32 %v957_v63, %v897_v1 }
 0x272   :  { %v996_v4 = vadd.f32 %v995_v3, %v958_v2 }
 0x274   :  { %v1027_v6 = vadd.f32 %v1026_v5, %v996_v4 }
 0x275   :  { %v1071_v7 = vpop.f32.mrf.mxu0 }
 0x276   :  { %v1072_v8 = vadd.f32 %v1071_v7, %v1027_v6 }
 0x278   :  { %v1101_v10 = vadd.f32 %v1100_v9, %v1072_v8 }
 0x27a   :  { %1103 = vst.msk [vmem:[%s1372_s3] sm:$0xff] %vm378_vm2, %v1101_v10 }

</bundles_post_ra>
